<compile_context>
chip_gen: v5e
topology: v5e:2x2
jax: 0.10.0
libtpu: 0.0.40
codegen_flags: <defaults>
</compile_context>

<pallas_src>
import functools

import jax
import jax.numpy as jnp
from jax import lax
from jax.experimental import pallas as pl
from jax.experimental.pallas import tpu as pltpu


def resnet_block_kernel(x_ref, w1_ref, b1_ref, w2_ref, b2_ref, out_ref,
                        pad_ref, *, H, RG, L):
    """One grid step = RG row-groups (each row-group = LP lane-packed images).

    x_ref   : (RG, H, L)     f32 input, L = LP*W*C lanes
    w*_ref  : (3, L, L)      bf16 per-row-offset lane-mixing matrices
    b*_ref  : (1, L)         f32 bias tiled over (LP, W)
    out_ref : (RG, H, L)     f32 output
    pad_ref : (RG*H+2, L)    bf16 VMEM scratch, height-padded activation slab
    """
    RGH = RG * H

    # Re-zero only the two shared border rows; the interior is fully
    # overwritten every step.  Per-step zeroing keeps the kernel correct under
    # "parallel" megacore scheduling.
    zrow = jnp.zeros((1, L), jnp.bfloat16)
    pad_ref[0:1, :] = zrow
    pad_ref[RGH + 1:RGH + 2, :] = zrow

    x = x_ref[...].reshape(RGH, L)            # f32, kept for the residual

    # Per-row validity masks for the +/-1 row taps: kill cross-image leakage
    # when several images are stacked along the sublane axis.
    h_idx = lax.broadcasted_iota(jnp.int32, (RGH, 1), 0) % H
    ok_up = h_idx != 0                        # row h-1 exists inside the image
    ok_dn = h_idx != (H - 1)                  # row h+1 exists inside the image
    zero_bf = jnp.zeros((), jnp.bfloat16)

    def conv3x3(w_ref):
        # dh = 1 : same row (bf16 operand straight from scratch)
        acc = jnp.dot(pad_ref[1:1 + RGH, :], w_ref[1],
                      preferred_element_type=jnp.float32)
        # dh = 0 : row above
        u = jnp.where(ok_up, pad_ref[0:RGH, :], zero_bf)
        acc = acc + jnp.dot(u, w_ref[0], preferred_element_type=jnp.float32)
        # dh = 2 : row below
        d = jnp.where(ok_dn, pad_ref[2:2 + RGH, :], zero_bf)
        acc = acc + jnp.dot(d, w_ref[2], preferred_element_type=jnp.float32)
        return acc

    # ---------------- conv1 + ReLU ----------------
    pad_ref[1:1 + RGH, :] = x.astype(jnp.bfloat16)
    h1 = jnp.maximum(conv3x3(w1_ref) + b1_ref[...], 0.0)       # (RGH, L) f32

    # ---------------- conv2 + residual + ReLU ----------------
    pad_ref[1:1 + RGH, :] = h1.astype(jnp.bfloat16)
    out = jnp.maximum(conv3x3(w2_ref) + b2_ref[...] + x, 0.0)

    out_ref[...] = out.reshape(RG, H, L).astype(out_ref.dtype)


def _merged_tap_weights(w_hwio, W, C, LP):
    """(3,3,C,C) HWIO -> (3, LP*W*C, LP*W*C) bf16 per-row-offset matrices.

    For each row offset dh the three dw taps are summed into one shifted
    block-diagonal matrix (width zero-padding is baked in by dropping the
    out-of-range blocks).  LP lane-packed images get kron(I_LP, .).
    """
    w = w_hwio.astype(jnp.float32)
    mats = []
    for dh in range(3):
        m = jnp.zeros((W * C, W * C), jnp.float32)
        for dw in range(3):
            shift = dw - 1                                   # input col w' = w + shift
            sel = jnp.eye(W, k=-shift, dtype=jnp.float32)    # sel[w', w]=1 iff w'-w==shift
            m = m + jnp.kron(sel, w[dh, dw])                 # block [w'*C+i, w*C+o]
        if LP > 1:
            m = jnp.kron(jnp.eye(LP, dtype=jnp.float32), m)
        mats.append(m)
    return jnp.stack(mats).astype(jnp.bfloat16)


def _lane_target():
    """MXU-width lane target: 128 on v2-v5 (128x128 MXUs), 256 on v6e/v7x."""
    try:
        kind = jax.devices()[0].device_kind.lower()
    except Exception:
        return 256
    if any(t in kind for t in ("v2", "v3", "v4", "v5")):
        return 128
    return 256


@jax.jit
def resnet_block(x_nchw, w1, b1, w2, b2):
    """x_nchw: (N, C, H, W) f32.  w*: (3, 3, C, C) HWIO.  b*: (C,)."""
    N, C, H, W = x_nchw.shape
    WC = W * C

    # ----- tiling parameters (Python ints, derived at trace time) -----
    lane_target = _lane_target()
    LP = max(1, min(lane_target // WC if WC <= lane_target else 1, N))
    L = LP * WC

    G = pl.cdiv(N, LP)                        # total row-groups (pre-pad)
    # ~2048 MXU rows per step at L<=128, ~1024 at L=256 (same ~1 MiB/step HBM
    # traffic either way); well inside v7x's 64 MiB VMEM with all temporaries.
    target_rows = 2048 if L <= 128 else 1024
    RG = max(1, min(G, target_rows // max(H, 1)))
    if G >= 2:                                # >=2 grid steps so the v7x
        RG = min(RG, pl.cdiv(G, 2))           # megacore "parallel" axis splits
    G_pad = pl.cdiv(G, RG) * RG               # no divisibility fallback: pad
    Np = G_pad * LP

    # ----- glue: single fused pad + transpose into the lane-packed layout ----
    x_f32 = x_nchw.astype(jnp.float32)
    if Np > N:
        x_f32 = jnp.pad(x_f32, ((0, Np - N), (0, 0), (0, 0), (0, 0)))
    x_lay = (x_f32.reshape(G_pad, LP, C, H, W)
             .transpose(0, 3, 1, 4, 2)         # (G, H, LP, W, C)
             .reshape(G_pad, H, L))

    w1m = _merged_tap_weights(w1, W, C, LP)    # (3, L, L) bf16
    w2m = _merged_tap_weights(w2, W, C, LP)
    b1t = jnp.tile(b1.astype(jnp.float32), LP * W).reshape(1, L)
    b2t = jnp.tile(b2.astype(jnp.float32), LP * W).reshape(1, L)

    kernel = functools.partial(resnet_block_kernel, H=H, RG=RG, L=L)

    # VMEM budget: in/out double-buffered f32 blocks + bf16 scratch +
    # single-buffered weights + ~4 live f32 temporaries (x, h1, acc, out).
    block_bytes = RG * H * L * 4
    est = (4 * block_bytes                     # in + out, double-buffered
           + (RG * H + 2) * L * 2              # bf16 scratch
           + 2 * 3 * L * L * 2 + 2 * 4 * L     # single-buffered weights/bias
           + 4 * block_bytes)                  # live f32 temporaries
    vmem_limit = min(48 * 1024 * 1024, max(32 * 1024 * 1024, int(est * 1.25)))

    invariant = pl.Buffered(1)                 # grid-invariant: no double-buf

    out_lay = pl.pallas_call(
        kernel,
        out_shape=jax.ShapeDtypeStruct((G_pad, H, L), jnp.float32),
        grid_spec=pltpu.PrefetchScalarGridSpec(
            num_scalar_prefetch=0,
            grid=(G_pad // RG,),
            in_specs=[
                pl.BlockSpec((RG, H, L), lambda g: (g, 0, 0)),
                pl.BlockSpec((3, L, L), lambda g: (0, 0, 0),
                             pipeline_mode=invariant),
                pl.BlockSpec((1, L), lambda g: (0, 0),
                             pipeline_mode=invariant),
                pl.BlockSpec((3, L, L), lambda g: (0, 0, 0),
                             pipeline_mode=invariant),
                pl.BlockSpec((1, L), lambda g: (0, 0),
                             pipeline_mode=invariant),
            ],
            out_specs=pl.BlockSpec((RG, H, L), lambda g: (g, 0, 0)),
            scratch_shapes=[pltpu.VMEM((RG * H + 2, L), jnp.bfloat16)],
        ),
        compiler_params=pltpu.CompilerParams(
            dimension_semantics=("parallel",),
            vmem_limit_bytes=vmem_limit,
        ),
    )(x_lay, w1m, b1t, w2m, b2t)

    # ----- glue: single transpose back to NCHW, drop batch padding -----
    out_nchw = (out_lay.reshape(G_pad, H, LP, W, C)
                .transpose(0, 2, 4, 1, 3)       # (G, LP, C, H, W)
                .reshape(Np, C, H, W))
    return out_nchw[:N]


def reference_resnet_block(x_nchw, w1, b1, w2, b2):
    """Pure-JAX f32 reference matching the PyTorch module (NCHW in/out)."""
    dn = ('NHWC', 'HWIO', 'NHWC')
    x = jnp.transpose(x_nchw, (0, 2, 3, 1)).astype(jnp.float32)
    y = lax.conv_general_dilated(x, w1, (1, 1), 'SAME',
                                 dimension_numbers=dn) + b1
    y = jnp.maximum(y, 0.0)
    y = lax.conv_general_dilated(y, w2, (1, 1), 'SAME',
                                 dimension_numbers=dn) + b2
    y = jnp.maximum(y + x, 0.0)
    return jnp.transpose(y, (0, 3, 1, 2))


if __name__ == "__main__":
    N, C, H, W = 2, 4, 16, 16        # num_features = 4

    key = jax.random.PRNGKey(0)
    k1, k2, k3, k4, k5 = jax.random.split(key, 5)
    x = jax.random.normal(k1, (N, C, H, W), jnp.float32)
    # deterministic synthetic parameters (Conv2d(C, C, 3, padding=1) x2), HWIO
    w1 = jax.random.normal(k2, (3, 3, C, C), jnp.float32) * 0.1
    b1 = jax.random.normal(k3, (C,), jnp.float32) * 0.1
    w2 = jax.random.normal(k4, (3, 3, C, C), jnp.float32) * 0.1
    b2 = jax.random.normal(k5, (C,), jnp.float32) * 0.1

    out = resnet_block(x, w1, b1, w2, b2)
    jax.block_until_ready(out)

    ref = reference_resnet_block(x, w1, b1, w2, b2)
    assert out.shape == (N, C, H, W), out.shape
    max_err = float(jnp.max(jnp.abs(out - ref)))
    # bf16 MXU operands with f32 accumulation -> ~1e-3-level error expected.
    assert jnp.allclose(out, ref, atol=1e-2, rtol=1e-2), max_err

    print("KERNEL_OK")
</pallas_src>

<mosaic_0001>
module attributes {stable_mosaic.version = 11 : i64} {
  func.func @resnet_block_kernel(%arg0: i32, %arg1: memref<1x16x128xf32, #tpu.memory_space<vmem>>, %arg2: memref<3x128x128xbf16, #tpu.memory_space<vmem>>, %arg3: memref<1x128xf32, #tpu.memory_space<vmem>>, %arg4: memref<3x128x128xbf16, #tpu.memory_space<vmem>>, %arg5: memref<1x128xf32, #tpu.memory_space<vmem>>, %arg6: memref<1x16x128xf32, #tpu.memory_space<vmem>>, %arg7: memref<18x128xbf16, #tpu.memory_space<vmem>>) attributes {dimension_semantics = [#tpu.dimension_semantics<parallel>], iteration_bounds = array<i64: 1>, scalar_prefetch = 0 : i64, scratch_operands = 1 : i64, tpu.core_type = #tpu.core_type<tc>, window_params = [{transform_indices = @transform_0, window_bounds = array<i64: 1, 16, 128>}, {pipeline_mode = #tpu.pipeline_mode<synchronous>, transform_indices = @transform_1, window_bounds = array<i64: 3, 128, 128>}, {pipeline_mode = #tpu.pipeline_mode<synchronous>, transform_indices = @transform_2, window_bounds = array<i64: 1, 128>}, {pipeline_mode = #tpu.pipeline_mode<synchronous>, transform_indices = @transform_3, window_bounds = array<i64: 3, 128, 128>}, {pipeline_mode = #tpu.pipeline_mode<synchronous>, transform_indices = @transform_4, window_bounds = array<i64: 1, 128>}, {transform_indices = @transform_5, window_bounds = array<i64: 1, 16, 128>}]} {
    %cst = arith.constant 0.000000e+00 : bf16
    %0 = vector.broadcast %cst : bf16 to vector<1x128xbf16>
    %c0 = arith.constant 0 : index
    %c0_0 = arith.constant 0 : index
    %1 = vector.load %arg7[%c0, %c0_0] : memref<18x128xbf16, #tpu.memory_space<vmem>>, vector<1x128xbf16>
    tpu.vector_store %arg7[%c0, %c0_0], %0 {strides = array<i32>} : memref<18x128xbf16, #tpu.memory_space<vmem>>, vector<1x128xbf16>,
    %c17 = arith.constant 17 : index
    %c0_1 = arith.constant 0 : index
    %2 = vector.load %arg7[%c17, %c0_1] : memref<18x128xbf16, #tpu.memory_space<vmem>>, vector<1x128xbf16>
    tpu.vector_store %arg7[%c17, %c0_1], %0 {strides = array<i32>} : memref<18x128xbf16, #tpu.memory_space<vmem>>, vector<1x128xbf16>,
    %c0_2 = arith.constant 0 : index
    %c0_3 = arith.constant 0 : index
    %c0_4 = arith.constant 0 : index
    %3 = vector.load %arg1[%c0_2, %c0_3, %c0_4] : memref<1x16x128xf32, #tpu.memory_space<vmem>>, vector<1x16x128xf32>
    %4 = vector.shape_cast %3 : vector<1x16x128xf32> to vector<16x128xf32>
    %5 = tpu.iota {dimensions = array<i32: 0>} : vector<16x1xi32>
    %c16_i32 = arith.constant 16 : i32
    %c0_i32 = arith.constant 0 : i32
    %6 = arith.cmpi eq, %c16_i32, %c0_i32 : i32
    %c1_i32 = arith.constant 1 : i32
    %7 = arith.select %6, %c1_i32, %c16_i32 : i32
    %8 = vector.broadcast %7 : i32 to vector<16x1xi32>
    %9 = arith.remsi %5, %8 : vector<16x1xi32>
    %c0_i32_5 = arith.constant 0 : i32
    %10 = vector.broadcast %c0_i32_5 : i32 to vector<16x1xi32>
    %11 = arith.cmpi ne, %9, %10 : vector<16x1xi32>
    %c0_i32_6 = arith.constant 0 : i32
    %12 = vector.broadcast %c0_i32_6 : i32 to vector<16x1xi32>
    %13 = arith.cmpi slt, %9, %12 : vector<16x1xi32>
    %c0_i32_7 = arith.constant 0 : i32
    %14 = arith.cmpi slt, %7, %c0_i32_7 : i32
    %15 = vector.broadcast %14 : i1 to vector<16x1xi1>
    %16 = vector.broadcast %15 : vector<16x1xi1> to vector<16x1xi1>
    %17 = arith.xori %13, %16 : vector<16x1xi1>
    %18 = arith.andi %17, %11 : vector<16x1xi1>
    %19 = vector.broadcast %7 : i32 to vector<16x1xi32>
    %20 = arith.addi %9, %19 : vector<16x1xi32>
    %21 = arith.select %18, %20, %9 : vector<16x1xi1>, vector<16x1xi32>
    %c0_i32_8 = arith.constant 0 : i32
    %22 = vector.broadcast %c0_i32_8 : i32 to vector<16x1xi32>
    %23 = arith.cmpi ne, %21, %22 : vector<16x1xi32>
    %c15_i32 = arith.constant 15 : i32
    %24 = vector.broadcast %c15_i32 : i32 to vector<16x1xi32>
    %25 = arith.cmpi ne, %21, %24 : vector<16x1xi32>
    %26 = arith.truncf %4 : vector<16x128xf32> to vector<16x128xbf16>
    %c1 = arith.constant 1 : index
    %c0_9 = arith.constant 0 : index
    %27 = vector.load %arg7[%c1, %c0_9] : memref<18x128xbf16, #tpu.memory_space<vmem>>, vector<16x128xbf16>
    tpu.vector_store %arg7[%c1, %c0_9], %26 {strides = array<i32>} : memref<18x128xbf16, #tpu.memory_space<vmem>>, vector<16x128xbf16>,
    %c1_10 = arith.constant 1 : index
    %c0_11 = arith.constant 0 : index
    %28 = vector.load %arg7[%c1_10, %c0_11] : memref<18x128xbf16, #tpu.memory_space<vmem>>, vector<16x128xbf16>
    %c1_12 = arith.constant 1 : index
    %c0_13 = arith.constant 0 : index
    %c0_14 = arith.constant 0 : index
    %29 = vector.load %arg2[%c1_12, %c0_13, %c0_14] : memref<3x128x128xbf16, #tpu.memory_space<vmem>>, vector<1x128x128xbf16>
    %30 = vector.shape_cast %29 : vector<1x128x128xbf16> to vector<128x128xbf16>
    %cst_15 = arith.constant dense<0.000000e+00> : vector<16x128xf32>
    %31 = tpu.matmul %28, %30, %cst_15 {dimension_numbers = #tpu.dot_dimension_numbers<[1], [0], [0], [1], [0, 0, 1, 1], [], []>} : vector<16x128xbf16>, vector<128x128xbf16>, vector<16x128xf32> -> vector<16x128xf32>
    %c0_16 = arith.constant 0 : index
    %c0_17 = arith.constant 0 : index
    %32 = vector.load %arg7[%c0_16, %c0_17] : memref<18x128xbf16, #tpu.memory_space<vmem>>, vector<16x128xbf16>
    %cst_18 = arith.constant 0.000000e+00 : bf16
    %33 = vector.shape_cast %23 : vector<16x1xi1> to vector<16x1xi1>
    %34 = vector.broadcast %33 : vector<16x1xi1> to vector<16x128xi1>
    %35 = vector.broadcast %cst_18 : bf16 to vector<16x128xbf16>
    %36 = arith.select %34, %32, %35 : vector<16x128xi1>, vector<16x128xbf16>
    %c0_19 = arith.constant 0 : index
    %c0_20 = arith.constant 0 : index
    %c0_21 = arith.constant 0 : index
    %37 = vector.load %arg2[%c0_19, %c0_20, %c0_21] : memref<3x128x128xbf16, #tpu.memory_space<vmem>>, vector<1x128x128xbf16>
    %38 = vector.shape_cast %37 : vector<1x128x128xbf16> to vector<128x128xbf16>
    %cst_22 = arith.constant dense<0.000000e+00> : vector<16x128xf32>
    %39 = tpu.matmul %36, %38, %cst_22 {dimension_numbers = #tpu.dot_dimension_numbers<[1], [0], [0], [1], [0, 0, 1, 1], [], []>} : vector<16x128xbf16>, vector<128x128xbf16>, vector<16x128xf32> -> vector<16x128xf32>
    %40 = arith.addf %31, %39 : vector<16x128xf32>
    %c2 = arith.constant 2 : index
    %c0_23 = arith.constant 0 : index
    %41 = vector.load %arg7[%c2, %c0_23] : memref<18x128xbf16, #tpu.memory_space<vmem>>, vector<16x128xbf16>
    %cst_24 = arith.constant 0.000000e+00 : bf16
    %42 = vector.shape_cast %25 : vector<16x1xi1> to vector<16x1xi1>
    %43 = vector.broadcast %42 : vector<16x1xi1> to vector<16x128xi1>
    %44 = vector.broadcast %cst_24 : bf16 to vector<16x128xbf16>
    %45 = arith.select %43, %41, %44 : vector<16x128xi1>, vector<16x128xbf16>
    %c2_25 = arith.constant 2 : index
    %c0_26 = arith.constant 0 : index
    %c0_27 = arith.constant 0 : index
    %46 = vector.load %arg2[%c2_25, %c0_26, %c0_27] : memref<3x128x128xbf16, #tpu.memory_space<vmem>>, vector<1x128x128xbf16>
    %47 = vector.shape_cast %46 : vector<1x128x128xbf16> to vector<128x128xbf16>
    %cst_28 = arith.constant dense<0.000000e+00> : vector<16x128xf32>
    %48 = tpu.matmul %45, %47, %cst_28 {dimension_numbers = #tpu.dot_dimension_numbers<[1], [0], [0], [1], [0, 0, 1, 1], [], []>} : vector<16x128xbf16>, vector<128x128xbf16>, vector<16x128xf32> -> vector<16x128xf32>
    %49 = arith.addf %40, %48 : vector<16x128xf32>
    %c0_29 = arith.constant 0 : index
    %c0_30 = arith.constant 0 : index
    %50 = vector.load %arg3[%c0_29, %c0_30] : memref<1x128xf32, #tpu.memory_space<vmem>>, vector<1x128xf32>
    %51 = vector.broadcast %50 : vector<1x128xf32> to vector<16x128xf32>
    %52 = arith.addf %49, %51 : vector<16x128xf32>
    %cst_31 = arith.constant 0.000000e+00 : f32
    %53 = vector.broadcast %cst_31 : f32 to vector<16x128xf32>
    %54 = arith.maximumf %52, %53 : vector<16x128xf32>
    %55 = arith.truncf %54 : vector<16x128xf32> to vector<16x128xbf16>
    %c1_32 = arith.constant 1 : index
    %c0_33 = arith.constant 0 : index
    %56 = vector.load %arg7[%c1_32, %c0_33] : memref<18x128xbf16, #tpu.memory_space<vmem>>, vector<16x128xbf16>
    tpu.vector_store %arg7[%c1_32, %c0_33], %55 {strides = array<i32>} : memref<18x128xbf16, #tpu.memory_space<vmem>>, vector<16x128xbf16>,
    %c1_34 = arith.constant 1 : index
    %c0_35 = arith.constant 0 : index
    %57 = vector.load %arg7[%c1_34, %c0_35] : memref<18x128xbf16, #tpu.memory_space<vmem>>, vector<16x128xbf16>
    %c1_36 = arith.constant 1 : index
    %c0_37 = arith.constant 0 : index
    %c0_38 = arith.constant 0 : index
    %58 = vector.load %arg4[%c1_36, %c0_37, %c0_38] : memref<3x128x128xbf16, #tpu.memory_space<vmem>>, vector<1x128x128xbf16>
    %59 = vector.shape_cast %58 : vector<1x128x128xbf16> to vector<128x128xbf16>
    %cst_39 = arith.constant dense<0.000000e+00> : vector<16x128xf32>
    %60 = tpu.matmul %57, %59, %cst_39 {dimension_numbers = #tpu.dot_dimension_numbers<[1], [0], [0], [1], [0, 0, 1, 1], [], []>} : vector<16x128xbf16>, vector<128x128xbf16>, vector<16x128xf32> -> vector<16x128xf32>
    %c0_40 = arith.constant 0 : index
    %c0_41 = arith.constant 0 : index
    %61 = vector.load %arg7[%c0_40, %c0_41] : memref<18x128xbf16, #tpu.memory_space<vmem>>, vector<16x128xbf16>
    %cst_42 = arith.constant 0.000000e+00 : bf16
    %62 = vector.shape_cast %23 : vector<16x1xi1> to vector<16x1xi1>
    %63 = vector.broadcast %62 : vector<16x1xi1> to vector<16x128xi1>
    %64 = vector.broadcast %cst_42 : bf16 to vector<16x128xbf16>
    %65 = arith.select %63, %61, %64 : vector<16x128xi1>, vector<16x128xbf16>
    %c0_43 = arith.constant 0 : index
    %c0_44 = arith.constant 0 : index
    %c0_45 = arith.constant 0 : index
    %66 = vector.load %arg4[%c0_43, %c0_44, %c0_45] : memref<3x128x128xbf16, #tpu.memory_space<vmem>>, vector<1x128x128xbf16>
    %67 = vector.shape_cast %66 : vector<1x128x128xbf16> to vector<128x128xbf16>
    %cst_46 = arith.constant dense<0.000000e+00> : vector<16x128xf32>
    %68 = tpu.matmul %65, %67, %cst_46 {dimension_numbers = #tpu.dot_dimension_numbers<[1], [0], [0], [1], [0, 0, 1, 1], [], []>} : vector<16x128xbf16>, vector<128x128xbf16>, vector<16x128xf32> -> vector<16x128xf32>
    %69 = arith.addf %60, %68 : vector<16x128xf32>
    %c2_47 = arith.constant 2 : index
    %c0_48 = arith.constant 0 : index
    %70 = vector.load %arg7[%c2_47, %c0_48] : memref<18x128xbf16, #tpu.memory_space<vmem>>, vector<16x128xbf16>
    %cst_49 = arith.constant 0.000000e+00 : bf16
    %71 = vector.shape_cast %25 : vector<16x1xi1> to vector<16x1xi1>
    %72 = vector.broadcast %71 : vector<16x1xi1> to vector<16x128xi1>
    %73 = vector.broadcast %cst_49 : bf16 to vector<16x128xbf16>
    %74 = arith.select %72, %70, %73 : vector<16x128xi1>, vector<16x128xbf16>
    %c2_50 = arith.constant 2 : index
    %c0_51 = arith.constant 0 : index
    %c0_52 = arith.constant 0 : index
    %75 = vector.load %arg4[%c2_50, %c0_51, %c0_52] : memref<3x128x128xbf16, #tpu.memory_space<vmem>>, vector<1x128x128xbf16>
    %76 = vector.shape_cast %75 : vector<1x128x128xbf16> to vector<128x128xbf16>
    %cst_53 = arith.constant dense<0.000000e+00> : vector<16x128xf32>
    %77 = tpu.matmul %74, %76, %cst_53 {dimension_numbers = #tpu.dot_dimension_numbers<[1], [0], [0], [1], [0, 0, 1, 1], [], []>} : vector<16x128xbf16>, vector<128x128xbf16>, vector<16x128xf32> -> vector<16x128xf32>
    %78 = arith.addf %69, %77 : vector<16x128xf32>
    %c0_54 = arith.constant 0 : index
    %c0_55 = arith.constant 0 : index
    %79 = vector.load %arg5[%c0_54, %c0_55] : memref<1x128xf32, #tpu.memory_space<vmem>>, vector<1x128xf32>
    %80 = vector.broadcast %79 : vector<1x128xf32> to vector<16x128xf32>
    %81 = arith.addf %78, %80 : vector<16x128xf32>
    %82 = arith.addf %81, %4 : vector<16x128xf32>
    %cst_56 = arith.constant 0.000000e+00 : f32
    %83 = vector.broadcast %cst_56 : f32 to vector<16x128xf32>
    %84 = arith.maximumf %82, %83 : vector<16x128xf32>
    %85 = vector.shape_cast %84 : vector<16x128xf32> to vector<1x16x128xf32>
    %c0_57 = arith.constant 0 : index
    %c0_58 = arith.constant 0 : index
    %c0_59 = arith.constant 0 : index
    %86 = vector.load %arg6[%c0_57, %c0_58, %c0_59] : memref<1x16x128xf32, #tpu.memory_space<vmem>>, vector<1x16x128xf32>
    tpu.vector_store %arg6[%c0_57, %c0_58, %c0_59], %85 {strides = array<i32>} : memref<1x16x128xf32, #tpu.memory_space<vmem>>, vector<1x16x128xf32>,
    return
  }
  func.func @transform_0(%arg0: i32) -> (i32, i32, i32) {
    %c0_i32 = arith.constant 0 : i32
    %c0_i32_0 = arith.constant 0 : i32
    %c0_i32_1 = arith.constant 0 : i32
    return %arg0, %c0_i32, %c0_i32_0 : i32, i32, i32
  }
  func.func @transform_1(%arg0: i32) -> (i32, i32, i32) {
    %c0_i32 = arith.constant 0 : i32
    %c0_i32_0 = arith.constant 0 : i32
    %c0_i32_1 = arith.constant 0 : i32
    %c0_i32_2 = arith.constant 0 : i32
    return %c0_i32, %c0_i32_0, %c0_i32_1 : i32, i32, i32
  }
  func.func @transform_2(%arg0: i32) -> (i32, i32) {
    %c0_i32 = arith.constant 0 : i32
    %c0_i32_0 = arith.constant 0 : i32
    %c0_i32_1 = arith.constant 0 : i32
    return %c0_i32, %c0_i32_0 : i32, i32
  }
  func.func @transform_3(%arg0: i32) -> (i32, i32, i32) {
    %c0_i32 = arith.constant 0 : i32
    %c0_i32_0 = arith.constant 0 : i32
    %c0_i32_1 = arith.constant 0 : i32
    %c0_i32_2 = arith.constant 0 : i32
    return %c0_i32, %c0_i32_0, %c0_i32_1 : i32, i32, i32
  }
  func.func @transform_4(%arg0: i32) -> (i32, i32) {
    %c0_i32 = arith.constant 0 : i32
    %c0_i32_0 = arith.constant 0 : i32
    %c0_i32_1 = arith.constant 0 : i32
    return %c0_i32, %c0_i32_0 : i32, i32
  }
  func.func @transform_5(%arg0: i32) -> (i32, i32, i32) {
    %c0_i32 = arith.constant 0 : i32
    %c0_i32_0 = arith.constant 0 : i32
    %c0_i32_1 = arith.constant 0 : i32
    return %arg0, %c0_i32, %c0_i32_0 : i32, i32, i32
  }
}

</mosaic_0001>

<bundles_post_ra>
// kernel: tile.13
= control target key start
LH: loop header
LB: loop body
LE: loop exit
PB: predicated region body
PF: predicated region fallthrough
CT: control target
= control target key end

     0   :  { %s40_s0 = inlined_call_operand.vmem [shape: f32[4], index: 0, kind: input, shape index: {}]   ;;  %s41_s1 = inlined_call_operand.vmem [shape: f32[32,4], index: 1, kind: output, shape index: {}]  }
   0x1   :  { %v4_v0 = vld [vmem:[%s40_s0] ss:$0 sm:$0xff] }
   0x2   :  { %5 = vst [vmem:[%s41_s1] sm:$0xff] %v4_v0 }
   0x3   :  { %12 = vst [vmem:[%s41_s1 + $0x8] sm:$0xff] %v4_v0 }
   0x4   :  { %13 = vst [vmem:[%s41_s1 + $0x10] sm:$0xff] %v4_v0 }
   0x5   :  { %14 = vst [vmem:[%s41_s1 + $0x18] sm:$0xff] %v4_v0 }

// kernel: tile.14
= control target key start
LH: loop header
LB: loop body
LE: loop exit
PB: predicated region body
PF: predicated region fallthrough
CT: control target
= control target key end

     0   :  { %s259_s10 = smov 124   ;;  %s260_s11 = smov 116   ;;  %vm3_vm0 = vcmask 31744   ;;  %vm9_vm1 = vcmask 1048544   ;;  %vm15_vm2 = vcmask 1015744   ;;  %vm21_vm3 = vcmask 982944   ;;  %s399_s0 = inlined_call_operand.vmem [shape: f32[32,4], index: 0, kind: input, shape index: {}]   ;;  %s400_s1 = inlined_call_operand.vmem [shape: f32[1,128], index: 1, kind: output, shape index: {}]  }
   0x1   :  { %v197_v0 = vld [vmem:[%s399_s0 + $0x1f] sm:$0x1]   ;;  %v199_v1 = vld [vmem:[%s399_s0 + $0x1d] sm:$0x1]   ;;  %v201_v2 = vld [vmem:[%s399_s0 + $0x1b] sm:$0x1]  }
   0x2   :  { %7 = vrot.lane.b32.xlu0 %v197_v0, %s259_s10  ;;  %19 = vrot.lane.b32.xlu1 %v199_v1, %s260_s11  ;;  %s261_s14 = smov 108   ;;  %v198_v3 = vld [vmem:[%s399_s0 + $0x1e] sm:$0x1]   ;;  %v200_v4 = vld [vmem:[%s399_s0 + $0x1c] sm:$0x1]   ;;  %s262_s19 = smov 120  }
   0x3   :  { %31 = vrot.lane.b32.xlu2 %v201_v2, %s261_s14  ;;  %s263_s20 = smov 112   ;;  %v202_v5 = vld [vmem:[%s399_s0 + $0x1a] sm:$0x1]   ;;  %s264_s23 = smov 104   ;;  %v203_v6 = vld [vmem:[%s399_s0 + $0x19] sm:$0x1]  }
   0x4   :  { %v204_v7 = vld [vmem:[%s399_s0 + $0x18] sm:$0x1]   ;;  %s265_s28 = smov 100   ;;  %s266_s29 = smov 96   ;;  %v205_v8 = vld [vmem:[%s399_s0 + $0x17] sm:$0x1]  }
   0x5   :  { %s267_s3 = smov 92   ;;  %v206_v9 = vld [vmem:[%s399_s0 + $0x16] sm:$0x1]   ;;  %v207_v10 = vld [vmem:[%s399_s0 + $0x15] sm:$0x1]   ;;  %s268_s8 = smov 88  }
   0x6   :  { %s269_s9 = smov 84   ;;  %v208_v11 = vld [vmem:[%s399_s0 + $0x14] sm:$0x1]   ;;  %s270_s12 = smov 80   ;;  %v209_v12 = vld [vmem:[%s399_s0 + $0x13] sm:$0x1]  }
   0x7   :  { %v210_v13 = vld [vmem:[%s399_s0 + $0x12] sm:$0x1]   ;;  %s271_s17 = smov 76   ;;  %s272_s18 = smov 72   ;;  %v211_v14 = vld [vmem:[%s399_s0 + $0x11] sm:$0x1]  }
   0x8   :  { %s273_s21 = smov 68   ;;  %v212_v15 = vld [vmem:[%s399_s0 + $0x10] sm:$0x1]   ;;  %v213_v16 = vld [vmem:[%s399_s0 + $0xf] sm:$0x1]   ;;  %s274_s26 = smov 64  }
   0x9   :  { %s275_s27 = smov 60   ;;  %v214_v17 = vld [vmem:[%s399_s0 + $0xe] sm:$0x1]   ;;  %s276_s30 = smov 56   ;;  %v215_v18 = vld [vmem:[%s399_s0 + $0xd] sm:$0x1]  }
   0xa   :  { %13 = vrot.lane.b32.xlu0 %v198_v3, %s262_s19  ;;  %25 = vrot.lane.b32.xlu1 %v200_v4, %s263_s20  ;;  %v216_v19 = vld [vmem:[%s399_s0 + $0xc] sm:$0x1]   ;;  %s277_s6 = smov 52   ;;  %s278_s7 = smov 48   ;;  %v217_v20 = vld [vmem:[%s399_s0 + $0xb] sm:$0x1]  }
   0xb   :  { %37 = vrot.lane.b32.xlu2 %v202_v5, %s264_s23  ;;  %s279_s10 = smov 44   ;;  %v218_v21 = vld [vmem:[%s399_s0 + $0xa] sm:$0x1]   ;;  %v219_v22 = vld [vmem:[%s399_s0 + $0x9] sm:$0x1]   ;;  %s280_s15 = smov 40  }
   0xc   :  { %s281_s16 = smov 36   ;;  %v220_v23 = vld [vmem:[%s399_s0 + $0x8] sm:$0x1]   ;;  %s282_s19 = smov 32   ;;  %v221_v24 = vld [vmem:[%s399_s0 + $0x7] sm:$0x1]  }
   0xd   :  { %v222_v25 = vld [vmem:[%s399_s0 + $0x6] sm:$0x1]   ;;  %s283_s24 = smov 28   ;;  %s284_s25 = smov 24   ;;  %v223_v26 = vld [vmem:[%s399_s0 + $0x5] sm:$0x1]  }
   0xe   :  { %v224_v27 = vld [vmem:[%s399_s0 + $0x4] sm:$0x1]   ;;  %v225_v28 = vld [vmem:[%s399_s0 + $0x3] sm:$0x1]   ;;  %s286_s4 = smov 16   ;;  %s287_s5 = smov 12  }
   0xf   :  { %v226_v29 = vld [vmem:[%s399_s0 + $0x2] sm:$0x1]   ;;  %v227_v30 = vld [vmem:[%s399_s0 + $0x1] sm:$0x1]   ;;  %s289_s11 = smov 4   ;;  %vm27_vm4 = vcmask 950144  }
  0x10   :  { %v2_v31 = vld [vmem:[%s399_s0] sm:$0x1]   ;;  %vm33_vm5 = vcmask 917344   ;;  %vm39_vm6 = vcmask 884544   ;;  %vm45_vm7 = vcmask 851744   ;;  %vm51_vm8 = vcmask 818944  }
  0x11   :  { %4 = vst.msk [vmem:[#allocation0] sm:$0x1] %vm3_vm0, %v2_v31   ;;  %vm57_vm9 = vcmask 786144   ;;  %vm63_vm10 = vcmask 753344   ;;  %vm69_vm11 = vcmask 720544   ;;  %vm75_vm12 = vcmask 687744  }
  0x12   :  { %43 = vrot.lane.b32.xlu0 %v203_v6, %s265_s28  ;;  %49 = vrot.lane.b32.xlu1 %v204_v7, %s266_s29  ;;  %s285_s28 = smov 20   ;;  %vm81_vm13 = vcmask 654944   ;;  %vm87_vm14 = vcmask 622144   ;;  %vm93_vm15 = vcmask 589344   ;;  %vm99_vm0 = vcmask 556544  }
  0x13   :  { %55 = vrot.lane.b32.xlu2 %v205_v8, %s267_s3 }
  0x1a   :  { %61 = vrot.lane.b32.xlu0 %v206_v9, %s268_s8  ;;  %67 = vrot.lane.b32.xlu1 %v207_v10, %s269_s9  ;;  %s288_s8 = smov 8  }
  0x1b   :  { %73 = vrot.lane.b32.xlu2 %v208_v11, %s270_s12 }
  0x22   :  { %79 = vrot.lane.b32.xlu0 %v209_v12, %s271_s17  ;;  %85 = vrot.lane.b32.xlu1 %v210_v13, %s272_s18 }
  0x23   :  { %91 = vrot.lane.b32.xlu2 %v211_v14, %s273_s21 }
  0x2a   :  { %97 = vrot.lane.b32.xlu0 %v212_v15, %s274_s26  ;;  %103 = vrot.lane.b32.xlu1 %v213_v16, %s275_s27 }
  0x2b   :  { %109 = vrot.lane.b32.xlu2 %v214_v17, %s276_s30 }
  0x32   :  { %115 = vrot.lane.b32.xlu0 %v215_v18, %s277_s6  ;;  %121 = vrot.lane.b32.xlu1 %v216_v19, %s278_s7 }
  0x33   :  { %127 = vrot.lane.b32.xlu2 %v217_v20, %s279_s10 }
  0x3a   :  { %133 = vrot.lane.b32.xlu0 %v218_v21, %s280_s15  ;;  %139 = vrot.lane.b32.xlu1 %v219_v22, %s281_s16 }
  0x3b   :  { %145 = vrot.lane.b32.xlu2 %v220_v23, %s282_s19 }
  0x42   :  { %151 = vrot.lane.b32.xlu0 %v221_v24, %s283_s24  ;;  %157 = vrot.lane.b32.xlu1 %v222_v25, %s284_s25 }
  0x43   :  { %163 = vrot.lane.b32.xlu2 %v223_v26, %s285_s28 }
  0x4a   :  { %169 = vrot.lane.b32.xlu0 %v224_v27, %s286_s4  ;;  %175 = vrot.lane.b32.xlu1 %v225_v28, %s287_s5 }
  0x4b   :  { %181 = vrot.lane.b32.xlu2 %v226_v29, %s288_s8 }
  0x52   :  { %187 = vrot.lane.b32.xlu0 %v227_v30, %s289_s11 }
  0x5d   :  { %v32_v32 = vpop.permute.xlu2 %31  }
  0x65   :  { %v38_v33 = vpop.permute.xlu2 %37  }
  0x6d   :  { %v56_v34 = vpop.permute.xlu2 %55  }
  0x74   :  { %v8_v35 = vpop.permute.xlu0 %7   ;;  %v20_v36 = vpop.permute.xlu1 %19  }
  0x75   :  { %10 = vst.msk [vmem:[#allocation0] sm:$0x1] %vm9_vm1, %v8_v35   ;;  %v74_v37 = vpop.permute.xlu2 %73   ;;  %vm105_vm1 = vcmask 523744  }
  0x7c   :  { %v14_v38 = vpop.permute.xlu0 %13   ;;  %v26_v39 = vpop.permute.xlu1 %25  }
  0x7d   :  { %16 = vst.msk [vmem:[#allocation0] sm:$0x1] %vm15_vm2, %v14_v38   ;;  %v92_v40 = vpop.permute.xlu2 %91   ;;  %vm111_vm2 = vcmask 490944  }
  0x7e   :  { %22 = vst.msk [vmem:[#allocation0] sm:$0x1] %vm21_vm3, %v20_v36   ;;  %vm117_vm3 = vcmask 458144  }
  0x7f   :  { %28 = vst.msk [vmem:[#allocation0] sm:$0x1] %vm27_vm4, %v26_v39   ;;  %vm123_vm4 = vcmask 425344  }
  0x80   :  { %34 = vst.msk [vmem:[#allocation0] sm:$0x1] %vm33_vm5, %v32_v32   ;;  %vm129_vm5 = vcmask 392544  }
  0x81   :  { %40 = vst.msk [vmem:[#allocation0] sm:$0x1] %vm39_vm6, %v38_v33   ;;  %vm135_vm6 = vcmask 359744  }
  0x84   :  { %v44_v41 = vpop.permute.xlu0 %43   ;;  %v50_v42 = vpop.permute.xlu1 %49  }
  0x85   :  { %46 = vst.msk [vmem:[#allocation0] sm:$0x1] %vm45_vm7, %v44_v41   ;;  %v110_v43 = vpop.permute.xlu2 %109   ;;  %vm141_vm7 = vcmask 326944  }
  0x86   :  { %52 = vst.msk [vmem:[#allocation0] sm:$0x1] %vm51_vm8, %v50_v42   ;;  %vm147_vm8 = vcmask 294144  }
  0x87   :  { %58 = vst.msk [vmem:[#allocation0] sm:$0x1] %vm57_vm9, %v56_v34   ;;  %vm153_vm9 = vcmask 261344  }
  0x8c   :  { %v62_v44 = vpop.permute.xlu0 %61   ;;  %v68_v45 = vpop.permute.xlu1 %67  }
  0x8d   :  { %64 = vst.msk [vmem:[#allocation0] sm:$0x1] %vm63_vm10, %v62_v44   ;;  %v128_v46 = vpop.permute.xlu2 %127   ;;  %vm159_vm10 = vcmask 228544  }
  0x8e   :  { %70 = vst.msk [vmem:[#allocation0] sm:$0x1] %vm69_vm11, %v68_v45   ;;  %vm165_vm11 = vcmask 195744  }
  0x8f   :  { %76 = vst.msk [vmem:[#allocation0] sm:$0x1] %vm75_vm12, %v74_v37   ;;  %vm171_vm12 = vcmask 162944  }
  0x94   :  { %v80_v47 = vpop.permute.xlu0 %79   ;;  %v86_v48 = vpop.permute.xlu1 %85  }
  0x95   :  { %82 = vst.msk [vmem:[#allocation0] sm:$0x1] %vm81_vm13, %v80_v47   ;;  %v146_v49 = vpop.permute.xlu2 %145   ;;  %vm177_vm13 = vcmask 130144  }
  0x96   :  { %88 = vst.msk [vmem:[#allocation0] sm:$0x1] %vm87_vm14, %v86_v48   ;;  %vm183_vm14 = vcmask 97344  }
  0x97   :  { %94 = vst.msk [vmem:[#allocation0] sm:$0x1] %vm93_vm15, %v92_v40   ;;  %vm189_vm15 = vcmask 64544  }
  0x9c   :  { %v98_v50 = vpop.permute.xlu0 %97   ;;  %v104_v51 = vpop.permute.xlu1 %103  }
  0x9d   :  { %100 = vst.msk [vmem:[#allocation0] sm:$0x1] %vm99_vm0, %v98_v50   ;;  %v164_v52 = vpop.permute.xlu2 %163  }
  0x9e   :  { %106 = vst.msk [vmem:[#allocation0] sm:$0x1] %vm105_vm1, %v104_v51  }
  0x9f   :  { %112 = vst.msk [vmem:[#allocation0] sm:$0x1] %vm111_vm2, %v110_v43  }
  0xa4   :  { %v116_v53 = vpop.permute.xlu0 %115   ;;  %v122_v54 = vpop.permute.xlu1 %121  }
  0xa5   :  { %118 = vst.msk [vmem:[#allocation0] sm:$0x1] %vm117_vm3, %v116_v53   ;;  %v182_v55 = vpop.permute.xlu2 %181  }
  0xa6   :  { %124 = vst.msk [vmem:[#allocation0] sm:$0x1] %vm123_vm4, %v122_v54  }
  0xa7   :  { %130 = vst.msk [vmem:[#allocation0] sm:$0x1] %vm129_vm5, %v128_v46  }
  0xac   :  { %v134_v56 = vpop.permute.xlu0 %133   ;;  %v140_v57 = vpop.permute.xlu1 %139  }
  0xad   :  { %136 = vst.msk [vmem:[#allocation0] sm:$0x1] %vm135_vm6, %v134_v56  }
  0xae   :  { %142 = vst.msk [vmem:[#allocation0] sm:$0x1] %vm141_vm7, %v140_v57  }
  0xaf   :  { %148 = vst.msk [vmem:[#allocation0] sm:$0x1] %vm147_vm8, %v146_v49  }
  0xb4   :  { %v152_v58 = vpop.permute.xlu0 %151   ;;  %v158_v59 = vpop.permute.xlu1 %157  }
  0xb5   :  { %154 = vst.msk [vmem:[#allocation0] sm:$0x1] %vm153_vm9, %v152_v58  }
  0xb6   :  { %160 = vst.msk [vmem:[#allocation0] sm:$0x1] %vm159_vm10, %v158_v59  }
  0xb7   :  { %166 = vst.msk [vmem:[#allocation0] sm:$0x1] %vm165_vm11, %v164_v52  }
  0xbc   :  { %v170_v60 = vpop.permute.xlu0 %169   ;;  %v176_v61 = vpop.permute.xlu1 %175  }
  0xbd   :  { %172 = vst.msk [vmem:[#allocation0] sm:$0x1] %vm171_vm12, %v170_v60  }
  0xbe   :  { %178 = vst.msk [vmem:[#allocation0] sm:$0x1] %vm177_vm13, %v176_v61  }
  0xbf   :  { %184 = vst.msk [vmem:[#allocation0] sm:$0x1] %vm183_vm14, %v182_v55  }
  0xc4   :  { %v188_v62 = vpop.permute.xlu0 %187  }
  0xc5   :  { %190 = vst.msk [vmem:[#allocation0] sm:$0x1] %vm189_vm15, %v188_v62  }
  0xcc   :  { %v193_v63 = vld [vmem:[#allocation0] sm:$0x1] }
  0xcd   :  { %196 = vst [vmem:[%s400_s1] sm:$0x1] %v193_v63 }

// kernel: resnet_block.1
= control target key start
LH: loop header
LB: loop body
LE: loop exit
PB: predicated region body
PF: predicated region fallthrough
CT: control target
= control target key end

     0   :  { %v36_v0 = vlaneseq  ;;  %vm23_vm0 = vcmask 1040384   ;;  %vm24_vm1 = vsmask.f32 256  ;;  %v26_v9 = vld [vmem:[#allocation2] sm:$0x1]  ;;  %vm91_vm8 = vcmask 1043456   ;;  %s1450_s1 = inlined_call_operand.vmem [shape: bf16[3,128,128], index: 1, kind: input, shape index: {}]   ;;  %s1451_s0 = inlined_call_operand.vmem [shape: f32[1,16,128], index: 0, kind: input, shape index: {}]   ;;  %s1452_s2 = inlined_call_operand.vmem [shape: f32[1,128], index: 2, kind: input, shape index: {}]   ;;  %s1453_s3 = inlined_call_operand.vmem [shape: bf16[3,128,128], index: 3, kind: input, shape index: {}]   ;;  %s1454_s4 = inlined_call_operand.vmem [shape: f32[1,128], index: 4, kind: input, shape index: {}]   ;;  %s1455_s5 = inlined_call_operand.vmem [shape: f32[1,16,128], index: 5, kind: output, shape index: {}]  }
   0x1   :  { %v1048_v1 = vld [vmem:[%s1450_s1 + $0x38] sm:$0xff]  ;;  %v1047_v5 = vld [vmem:[%s1450_s1 + $0x30] sm:$0xff]  ;;  %v1046_v10 = vld [vmem:[%s1450_s1 + $0x28] sm:$0xff]  ;;  %vm29_vm2 = vsmask.f32 7938  ;;  %vm1086_vm9 = vmmov 1  }
   0x2   :  { %v1040_v2 = vld [vmem:[%s1450_s1 + $0x78] sm:$0xff]  ;;  %v1127_v4 = vshrl.u32 %v36_v0, 7  ;;  %198 = vmatpush.bf16.msra.mxu0 %v1048_v1  ;;  %v1039_v6 = vld [vmem:[%s1450_s1 + $0x70] sm:$0xff]  ;;  %v1038_v11 = vld [vmem:[%s1450_s1 + $0x68] sm:$0xff]  ;;  %vm69_vm4 = vsmask.f32 4368 }
   0x3   :  { %v1056_v3 = vld [vmem:[%s1450_s1 + $0xb8] sm:$0xff]  ;;  %282 = vmatpush.bf16.msra.mxu1 %v1040_v2  ;;  %v1055_v7 = vld [vmem:[%s1450_s1 + $0xb0] sm:$0xff]  ;;  %v1054_v13 = vld [vmem:[%s1450_s1 + $0xa8] sm:$0xff]  ;;  %v1087_v38 = vmov 0   ;;  %vm305_vm12 = vcmask 1044484  }
   0x4   :  { %414 = vmatpush.bf16.msra.mxu2 %v1056_v3  ;;  %v38_v8 = vadd.s32 8, %v1127_v4  ;;  %vm1150_vm3 = vmand %vm23_vm0, %vm24_vm1  ;;  %v1157_v15 = vld [vmem:[%s1451_s0] sm:$0xff]  ;;  %v1162_v16 = vld [vmem:[%s1451_s0 + $0x8] sm:$0xff]  ;;  %v43_v37 = vand.u32 15, %v1127_v4  ;;  %v314_v48 = vunpack.c.l.b16 %v1087_v38  ;;  %v315_v49 = vunpack.c.h.b16 %v1087_v38 }
   0x5   :  { %v1045_v17 = vld [vmem:[%s1450_s1 + $0x20] sm:$0xff]  ;;  %v27_v18 = vsel %vm1150_vm3, 0, %v26_v9  ;;  %vm1171_vm5 = vmand %vm23_vm0, %vm29_vm2  ;;  %v67_v20 = vpack.c.bf16 %v1157_v15, %v1157_v15  ;;  %v68_v21 = vpack.c.bf16 %v1162_v16, %v1162_v16  ;;  %v31_v22 = vld [vmem:[#allocation2 + $0x8] sm:$0x1] }
   0x6   :  { %199 = vmatpush.bf16.msra.mxu0 %v1047_v5  ;;  %v50_v12 = vand.u32 15, %v38_v8  ;;  %v1037_v23 = vld [vmem:[%s1450_s1 + $0x60] sm:$0xff]  ;;  %28 = vst [vmem:[#allocation2] sm:$0x1] %v27_v18  ;;  %v32_v26 = vsel %vm1171_vm5, 0, %v31_v22  ;;  %vm1193_vm7 = vmor %vm24_vm1, %vm69_vm4  ;;  %v1044_v35 = vld [vmem:[%s1450_s1 + $0x18] sm:$0xff] }
   0x7   :  { %283 = vmatpush.bf16.msra.mxu1 %v1039_v6  ;;  %v1053_v24 = vld [vmem:[%s1450_s1 + $0xa0] sm:$0xff]  ;;  %v72_v27 = vshrl.u32 %v67_v20, 16  ;;  %v75_v28 = vshll.u32 %v67_v20, 16  ;;  %v80_v29 = vshrl.u32 %v68_v21, 16  ;;  %v83_v30 = vshll.u32 %v68_v21, 16  ;;  %vm1197_vm10 = vmpackc.low %vm1086_vm9, %vm1086_vm9  ;;  %v1036_v36 = vld [vmem:[%s1450_s1 + $0x58] sm:$0xff] }
   0x8   :  { %415 = vmatpush.bf16.msra.mxu2 %v1055_v7  ;;  %vm1185_vm6 = vcmp.ne.s32.totalorder %v50_v12, 15  ;;  %33 = vst [vmem:[#allocation2 + $0x8] sm:$0x1] %v32_v26  ;;  %v303_v39 = vsel %vm1197_vm10, 65537, %v1087_v38  ;;  %v1052_v40 = vld [vmem:[%s1450_s1 + $0x98] sm:$0xff]  ;;  %vm1218_vm13 = vmand %vm91_vm8, %vm29_vm2  ;;  %v1043_v50 = vld [vmem:[%s1450_s1 + $0x10] sm:$0xff] }
   0x9   :  { %v74_v32 = vrot.slane %v72_v27, 7  ;;  %v82_v33 = vrot.slane %v80_v29, 7  ;;  %vm302_vm11 = vmpackc.low %vm1185_vm6, %vm1185_vm6  ;;  %v307_v47 = vrot.slane %v303_v39, 7  ;;  %v1035_v55 = vld [vmem:[%s1450_s1 + $0x50] sm:$0xff]  ;;  %vm1241_vm15 = vcmp.ne.s32.totalorder %v43_v37, 0  ;;  %v1042_v8 = vld [vmem:[%s1450_s1 + $0x8] sm:$0xff] }
   0xa   :  { %200 = vmatpush.bf16.msra.mxu0 %v1046_v10  ;;  %v304_v46 = vsel %vm302_vm11, 65537, %v1087_v38  ;;  %vm1229_vm14 = vmor %vm23_vm0, %vm305_vm12  ;;  %v1051_v61 = vld [vmem:[%s1450_s1 + $0x90] sm:$0xff]  ;;  %v1034_v9 = vld [vmem:[%s1450_s1 + $0x48] sm:$0xff] }
   0xb   :  { %284 = vmatpush.bf16.msra.mxu1 %v1038_v11  ;;  %v77_v41 = vor.u32 %v75_v28, %v74_v32  ;;  %v78_v42 = vrot.slane %v74_v32, 4  ;;  %v85_v43 = vor.u32 %v83_v30, %v82_v33  ;;  %v87_v44 = vrot.slane %v82_v33, 4  ;;  %vm124_vm2 = vmpackc.low %vm1241_vm15, %vm1241_vm15  ;;  %v1050_v10 = vld [vmem:[%s1450_s1 + $0x88] sm:$0xff]  ;;  %v1041_v18 = vld [vmem:[%s1450_s1] sm:$0xff] }
   0xc   :  { %416 = vmatpush.bf16.msra.mxu2 %v1054_v13  ;;  %v309_v53 = vrot.slane %v304_v46, 7  ;;  %v308_v57 = vrot.slane %v307_v47, 4  ;;  %v312_v59 = vunpack.c.l.b16 %v307_v47  ;;  %v313_v60 = vunpack.c.h.b16 %v307_v47  ;;  %v1033_v19 = vld [vmem:[%s1450_s1 + $0x40] sm:$0xff]  ;;  %v1073_v54 = vld [vmem:[%s1453_s3 + $0x38] sm:$0xff] }
   0xd   :  { %v86_v51 = vsel %vm1193_vm7, %v78_v42, %v85_v43  ;;  %v93_v52 = vld [vmem:[#allocation2] sm:$0xf]  ;;  %558 = vmatpush.bf16.msra.mxu3 %v1073_v54 }
   0xe   :  { %201 = vmatpush.bf16.msra.mxu0 %v1045_v17  ;;  %v94_v56 = vsel %vm1218_vm13, %v77_v41, %v93_v52  ;;  %96 = vst [vmem:[#allocation2 + $0x4] sm:$0xf] %v86_v51  ;;  %v311_v0 = vrot.slane %v309_v53, 4  ;;  %v310_v1 = vsel %vm1229_vm14, %v308_v57, %v309_v53  ;;  %vm1249_vm0 = vcmp.ne.s32.totalorder %v312_v59, %v314_v48  ;;  %v1049_v25 = vld [vmem:[%s1450_s1 + $0x80] sm:$0xff]  ;;  %v1065_v57 = vld [vmem:[%s1453_s3 + $0x78] sm:$0xff]  ;;  %v1071_v59 = vld [vmem:[%s1453_s3 + $0x28] sm:$0xff] }
   0xf   :  { %285 = vmatpush.bf16.msra.mxu1 %v1037_v23  ;;  %v97_v58 = vld [vmem:[#allocation2 + $0x8] sm:$0x1]  ;;  %95 = vst [vmem:[#allocation2] sm:$0xf] %v94_v56  ;;  %vm1253_vm1 = vcmp.ne.s32.totalorder %v313_v60, %v315_v49  ;;  %v319_v4 = vunpack.c.l.b16 %v310_v1  ;;  %v320_v5 = vunpack.c.h.b16 %v310_v1  ;;  %vm220_vm14 = vsmask.f32 7424 }
  0x10   :  { %417 = vmatpush.bf16.msra.mxu2 %v1053_v24  ;;  %v98_v63 = vsel %vm1150_vm3, %v87_v44, %v97_v58  ;;  %v326_v6 = vunpack.c.l.b16 %v311_v0  ;;  %v327_v7 = vunpack.c.h.b16 %v311_v0  ;;  %vm318_vm4 = vmpackc.low %vm1253_vm1, %vm1249_vm0  ;;  %v1072_v56 = vld [vmem:[%s1453_s3 + $0x30] sm:$0xff]  ;;  %v1063_v0 = vld [vmem:[%s1453_s3 + $0x68] sm:$0xff] }
  0x11   :  { %99 = vst [vmem:[#allocation2 + $0x8] sm:$0x1] %v98_v63  ;;  %vm1273_vm5 = vcmp.ne.s32.totalorder %v319_v4, %v314_v48  ;;  %vm1277_vm6 = vcmp.ne.s32.totalorder %v320_v5, %v315_v49  ;;  %559 = vmatpush.bf16.msra.mxu3 %v1072_v56  ;;  %v1080_v58 = vld [vmem:[%s1453_s3 + $0xb0] sm:$0xff]  ;;  %v1070_v63 = vld [vmem:[%s1453_s3 + $0x20] sm:$0xff]  ;;  %v1069_v4 = vld [vmem:[%s1453_s3 + $0x18] sm:$0xff] }
  0x12   :  { %202 = vmatpush.bf16.msra.mxu0 %v1044_v35  ;;  %vm1281_vm8 = vcmp.ne.s32.totalorder %v326_v6, %v314_v48  ;;  %vm1285_vm9 = vcmp.ne.s32.totalorder %v327_v7, %v315_v49  ;;  %vm1456_vm11 = vmpackc.low %vm1277_vm6, %vm1273_vm5  ;;  %v1064_v60 = vld [vmem:[%s1453_s3 + $0x70] sm:$0xff]  ;;  %v1078_v1 = vld [vmem:[%s1453_s3 + $0xa0] sm:$0xff] }
  0x13   :  { %286 = vmatpush.bf16.msra.mxu1 %v1036_v36  ;;  %vm332_vm12 = vmpackc.low %vm1285_vm9, %vm1281_vm8  ;;  %v1062_v5 = vld [vmem:[%s1453_s3 + $0x60] sm:$0xff]  ;;  %v1077_v6 = vld [vmem:[%s1453_s3 + $0x98] sm:$0xff] }
  0x14   :  { %418 = vmatpush.bf16.msra.mxu2 %v1052_v40  ;;  %v1068_v7 = vld [vmem:[%s1453_s3 + $0x10] sm:$0xff] }
  0x15   :  { %v101_v20 = vld [vmem:[#allocation2 + $0x4] sm:$0xf]  ;;  %560 = vmatpush.bf16.msra.mxu3 %v1071_v59 }
  0x16   :  { %203 = vmatpush.bf16.msra.mxu0 %v1043_v50  ;;  %v1303_v21 = vld [vmem:[#allocation2] sm:$0xf]  ;;  %v127_v22 = vsel %vm1197_vm10, %v101_v20, 0  ;;  %v334_v30 = vsel %vm1456_vm11, %v101_v20, 0  ;;  %vm361_vm11 = vcmask 1046528   ;;  %v1060_v20 = vld [vmem:[%s1453_s3 + $0x50] sm:$0xff] }
  0x17   :  { %287 = vmatpush.bf16.msra.mxu1 %v1035_v55  ;;  %v1032_v23 = vld [vmem:[#allocation2] sm:$0xff]  ;;  %v126_v26 = vsel %vm124_vm2, %v1303_v21, 0  ;;  %v147_v27 = vunpack.c.l.b16 %v127_v22  ;;  %v357_v39 = vunpack.c.l.b16 %v334_v30  ;;  %v1081_v55 = vld [vmem:[%s1453_s3 + $0xb8] sm:$0xff] }
  0x18   :  { %419 = vmatpush.bf16.msra.mxu2 %v1051_v61  ;;  %v296_v24 = vld [vmem:[#allocation2] sm:$0xe]  ;;  %v102_v28 = vld [vmem:[#allocation2 + $0x8] sm:$0x1]  ;;  %v146_v32 = vunpack.c.l.b16 %v126_v26  ;;  %v222_v35 = vshrl.u32 %v1032_v23, 16  ;;  %v224_v36 = vshll.u32 %v1032_v23, 16 }
  0x19   :  { %v333_v29 = vsel %vm318_vm4, %v296_v24, 0  ;;  %v217_v33 = vunpack.c.l.b16 %v102_v28  ;;  %v335_v37 = vsel %vm332_vm12, %v102_v28, 0  ;;  %v1079_v61 = vld [vmem:[%s1453_s3 + $0xa8] sm:$0xff]  ;;  %561 = vmatpush.bf16.msra.mxu3 %v1070_v63  ;;  %v1084_v24 = vld [vmem:[%s1452_s2] ss:$0 sm:$0xff] }
  0x1a   :  { %204 = vmatpush.bf16.msra.mxu0 %v1042_v8  ;;  %v356_v38 = vunpack.c.l.b16 %v333_v29  ;;  %v148_v40 = vpack.c.b16 %v147_v27, %v146_v32  ;;  %v226_v42 = vrot.slane %v224_v36, 1  ;;  %v358_v43 = vunpack.c.l.b16 %v335_v37  ;;  %v1061_v8 = vld [vmem:[%s1453_s3 + $0x58] sm:$0xff]  ;;  %v1075_v23 = vld [vmem:[%s1453_s3 + $0x88] sm:$0xff]  ;;  %v1058_v36 = vld [vmem:[%s1453_s3 + $0x40] sm:$0xff] }
  0x1b   :  { %288 = vmatpush.bf16.msra.mxu1 %v1034_v9  ;;  %v219_v41 = vpack.c.b16 %v217_v33, %v217_v33  ;;  %v1059_v26 = vld [vmem:[%s1453_s3 + $0x48] sm:$0xff]  ;;  %v1074_v33 = vld [vmem:[%s1453_s3 + $0x80] sm:$0xff] }
  0x1c   :  { %420 = vmatpush.bf16.msra.mxu2 %v1050_v10  ;;  %v359_v44 = vpack.c.b16 %v357_v39, %v356_v38  ;;  %v227_v46 = vor.u32 %v226_v42, %v222_v35  ;;  %v360_v48 = vpack.c.b16 %v358_v43, %v358_v43 }
  0x1d   :  { %v229_v47 = vshll.u32 %v219_v41, 16  ;;  %562 = vmatpush.bf16.msra.mxu3 %v1069_v4 }
  0x1e   :  { %205 = vmatpush.bf16.msra.mxu0 %v1041_v18  ;;  %v362_v49 = vrot.slane %v359_v44, 1  ;;  %v363_v51 = vrot.slane %v360_v48, 1  ;;  %v1076_v18 = vld [vmem:[%s1453_s3 + $0x90] sm:$0xff] }
  0x1f   :  { %289 = vmatpush.bf16.msra.mxu1 %v1033_v19  ;;  %v231_v50 = vrot.slane %v229_v47, 1  ;;  %v1067_v19 = vld [vmem:[%s1453_s3 + $0x8] sm:$0xff] }
  0x20   :  { %421 = vmatpush.bf16.msra.mxu2 %v1049_v25  ;;  %v364_v53 = vsel %vm361_vm11, %v362_v49, %v363_v51  ;;  %v1066_v25 = vld [vmem:[%s1453_s3] sm:$0xff] }
  0x21   :  { %206 = vmatmul.bf16.vlgmr.msra.gmra.mxu0 %v148_v40  ;;  %v232_v52 = vsel %vm220_vm14, %v227_v46, %v231_v50  ;;  %563 = vmatpush.bf16.msra.mxu3 %v1068_v7 }
  0x22   :  { %290 = vmatmul.bf16.vlgmr.msra.gmra.mxu1 %v232_v52  ;;  %641 = vmatpush.bf16.msrb.mxu0 %v1065_v57 }
  0x23   :  { %422 = vmatmul.bf16.vlgmr.msra.gmra.mxu2 %v364_v53  ;;  %736 = vmatpush.bf16.msrb.mxu1 %v1081_v55  ;;  %v463_v53 = vld [vmem:[#allocation2 + $0x8] sm:$0x1] }
  0x25   :  { %564 = vmatpush.bf16.msra.mxu3 %v1067_v19 }
  0x26   :  { %642 = vmatpush.bf16.msrb.mxu0 %v1064_v60 }
  0x27   :  { %737 = vmatpush.bf16.msrb.mxu1 %v1080_v58 }
  0x29   :  { %565 = vmatpush.bf16.msra.mxu3 %v1066_v25 }
  0x2a   :  { %643 = vmatpush.bf16.msrb.mxu0 %v1063_v0 }
  0x2b   :  { %738 = vmatpush.bf16.msrb.mxu1 %v1079_v61 }
  0x2e   :  { %644 = vmatpush.bf16.msrb.mxu0 %v1062_v5 }
  0x2f   :  { %739 = vmatpush.bf16.msrb.mxu1 %v1078_v1 }
  0x32   :  { %645 = vmatpush.bf16.msrb.mxu0 %v1061_v8 }
  0x33   :  { %740 = vmatpush.bf16.msrb.mxu1 %v1077_v6 }
  0x36   :  { %646 = vmatpush.bf16.msrb.mxu0 %v1060_v20 }
  0x37   :  { %741 = vmatpush.bf16.msrb.mxu1 %v1076_v18 }
  0x3a   :  { %647 = vmatpush.bf16.msrb.mxu0 %v1059_v26 }
  0x3b   :  { %742 = vmatpush.bf16.msrb.mxu1 %v1075_v23 }
  0x3e   :  { %648 = vmatpush.bf16.msrb.mxu0 %v1058_v36 }
  0x3f   :  { %743 = vmatpush.bf16.msrb.mxu1 %v1074_v33 }
  0x9e   :  { %v207_v9 = vpop.f32.mrf.mxu0 }
  0x9f   :  { %v291_v10 = vpop.f32.mrf.mxu1 }
  0xa0   :  { %v292_v22 = vadd.f32 %v291_v10, %v207_v9 }
  0xa6   :  { %v423_v27 = vpop.f32.mrf.mxu2  ;;  %v209_v30 = vpop.f32.mrf.mxu0 }
  0xa7   :  { %v428_v28 = vadd.f32 %v423_v27, %v292_v22  ;;  %v293_v32 = vpop.f32.mrf.mxu1 }
  0xa8   :  { %v294_v38 = vadd.f32 %v293_v32, %v209_v30 }
  0xa9   :  { %v434_v29 = vadd.f32 %v1084_v24, %v428_v28  ;;  %v1085_v28 = vld [vmem:[%s1454_s4] ss:$0 sm:$0xff] }
  0xab   :  { %v436_v35 = vmax.f32 %v434_v29, 0.0 }
  0xad   :  { %v438_v37 = vpack.c.bf16 %v436_v35, %v436_v35 }
  0xae   :  { %v425_v39 = vpop.f32.mrf.mxu2 }
  0xaf   :  { %v441_v40 = vshrl.u32 %v438_v37, 16  ;;  %v429_v41 = vadd.f32 %v425_v39, %v294_v38  ;;  %v444_v43 = vshll.u32 %v438_v37, 16 }
  0xb1   :  { %v443_v42 = vrot.slane %v441_v40, 7  ;;  %v435_v44 = vadd.f32 %v1084_v24, %v429_v41 }
  0xb3   :  { %v446_v46 = vor.u32 %v444_v43, %v443_v42  ;;  %v437_v47 = vmax.f32 %v435_v44, 0.0  ;;  %v447_v54 = vrot.slane %v443_v42, 4 }
  0xb5   :  { %v460_v48 = vsel %vm1218_vm13, %v446_v46, %v1303_v21  ;;  %v439_v49 = vpack.c.bf16 %v437_v47, %v437_v47 }
  0xb6   :  { %461 = vst [vmem:[#allocation2] sm:$0xf] %v460_v48 }
  0xb7   :  { %v449_v50 = vshrl.u32 %v439_v49, 16  ;;  %v452_v52 = vshll.u32 %v439_v49, 16 }
  0xb9   :  { %v451_v51 = vrot.slane %v449_v50, 7 }
  0xbb   :  { %v454_v55 = vor.u32 %v452_v52, %v451_v51  ;;  %v456_v56 = vrot.slane %v451_v51, 4 }
  0xbd   :  { %v455_v57 = vsel %vm1193_vm7, %v447_v54, %v454_v55  ;;  %v464_v58 = vsel %vm1150_vm3, %v456_v56, %v463_v53  ;;  %v466_v59 = vld [vmem:[#allocation2] sm:$0xf]  ;;  %vm1485_vm3 = vmpackc.low %vm1277_vm6, %vm1273_vm5 }
  0xbe   :  { %462 = vst [vmem:[#allocation2 + $0x4] sm:$0xf] %v455_v57  ;;  %v655_v45 = vld [vmem:[#allocation2] sm:$0xe]  ;;  %v486_v21 = vsel %vm124_vm2, %v466_v59, 0 }
  0xbf   :  { %465 = vst [vmem:[#allocation2 + $0x8] sm:$0x1] %v464_v58  ;;  %v656_v31 = vsel %vm318_vm4, %v655_v45, 0  ;;  %v506_v63 = vunpack.c.l.b16 %v486_v21 }
  0xc0   :  { %v679_v1 = vunpack.c.l.b16 %v656_v31 }
  0xc5   :  { %v467_v60 = vld [vmem:[#allocation2 + $0x4] sm:$0xf] }
  0xc6   :  { %v1057_v61 = vld [vmem:[#allocation2] sm:$0xff]  ;;  %v487_v14 = vsel %vm1197_vm10, %v467_v60, 0  ;;  %v657_v62 = vsel %vm1485_vm3, %v467_v60, 0  ;;  %v468_v0 = vld [vmem:[#allocation2 + $0x8] sm:$0x1] }
  0xc7   :  { %v507_v4 = vunpack.c.l.b16 %v487_v14  ;;  %v680_v3 = vunpack.c.l.b16 %v657_v62  ;;  %v658_v2 = vsel %vm332_vm12, %v468_v0, 0  ;;  %v577_v5 = vunpack.c.l.b16 %v468_v0 }
  0xc8   :  { %v681_v34 = vunpack.c.l.b16 %v658_v2  ;;  %v583_v6 = vshll.u32 %v1057_v61, 16  ;;  %v581_v11 = vshrl.u32 %v1057_v61, 16 }
  0xc9   :  { %v508_v7 = vpack.c.b16 %v507_v4, %v506_v63  ;;  %v682_v8 = vpack.c.b16 %v680_v3, %v679_v1  ;;  %v579_v12 = vpack.c.b16 %v577_v5, %v577_v5 }
  0xca   :  { %v683_v9 = vpack.c.b16 %v681_v34, %v681_v34  ;;  %v585_v10 = vrot.slane %v583_v6, 1 }
  0xcb   :  { %566 = vmatmul.bf16.vlgmr.msra.gmra.mxu3 %v508_v7  ;;  %v684_v18 = vrot.slane %v682_v8, 1  ;;  %v588_v19 = vshll.u32 %v579_v12, 16 }
  0xcc   :  { %v685_v20 = vrot.slane %v683_v9, 1  ;;  %v586_v22 = vor.u32 %v585_v10, %v581_v11 }
  0xcd   :  { %v590_v23 = vrot.slane %v588_v19, 1 }
  0xce   :  { %v686_v17 = vsel %vm361_vm11, %v684_v18, %v685_v20 }
  0xcf   :  { %744 = vmatmul.bf16.vlgmr.msrb.gmra.mxu1 %v686_v17  ;;  %v591_v13 = vsel %vm220_vm14, %v586_v22, %v590_v23 }
  0xd0   :  { %649 = vmatmul.bf16.vlgmr.msrb.gmra.mxu0 %v591_v13 }
 0x14c   :  { %v745_v25 = vpop.f32.mrf.mxu1 }
 0x14d   :  { %v650_v24 = vpop.f32.mrf.mxu0 }
 0x14e   :  { %v567_v26 = vpop.f32.mrf.mxu3 }
 0x14f   :  { %v651_v27 = vadd.f32 %v650_v24, %v567_v26 }
 0x151   :  { %v750_v29 = vadd.f32 %v745_v25, %v651_v27 }
 0x153   :  { %v756_v30 = vadd.f32 %v1085_v28, %v750_v29 }
 0x154   :  { %v747_v38 = vpop.f32.mrf.mxu1 }
 0x155   :  { %v758_v32 = vadd.f32 %v756_v30, %v1157_v15  ;;  %v652_v33 = vpop.f32.mrf.mxu0 }
 0x156   :  { %v569_v35 = vpop.f32.mrf.mxu3 }
 0x157   :  { %v760_v36 = vmax.f32 %v758_v32, 0.0  ;;  %v653_v37 = vadd.f32 %v652_v33, %v569_v35 }
 0x159   :  { %762 = vst [vmem:[%s1455_s5] sm:$0xff] %v760_v36  ;;  %v751_v39 = vadd.f32 %v747_v38, %v653_v37 }
 0x15b   :  { %v757_v40 = vadd.f32 %v1085_v28, %v751_v39 }
 0x15d   :  { %v759_v41 = vadd.f32 %v757_v40, %v1162_v16 }
 0x15f   :  { %v761_v42 = vmax.f32 %v759_v41, 0.0 }
 0x161   :  { %763 = vst [vmem:[%s1455_s5 + $0x8] sm:$0xff] %v761_v42 }

</bundles_post_ra>
